<compile_context>
chip_gen: v7x
topology: tpu7x:2x2x1
jax: 0.10.0
libtpu: 0.0.40
codegen_flags: <defaults>
</compile_context>

<pallas_src>
import functools
import math

import jax
import jax.numpy as jnp
from jax.experimental import pallas as pl
from jax.experimental.pallas import tpu as pltpu

# ----------------------------- tiny BERT config -----------------------------
VOCAB = 100
HIDDEN = 32
NUM_LAYERS = 2
NUM_HEADS = 2
HEAD_DIM = HIDDEN // NUM_HEADS
INTERMEDIATE = 64
MAX_POS = 16
TYPE_VOCAB = 2          # module forces type_vocab_size = 2
LN_EPS = 1e-12
INIT_RANGE = 0.02       # bert initializer_range


# --------------------------- in-kernel math helpers --------------------------
def _fast_recip(x):
    """EUP approximate reciprocal + one Newton step (~f32 accuracy)."""
    r = pl.reciprocal(x, approx=True)
    return r * (2.0 - x * r)


def _layer_norm(h, g, b, eps):
    mu = jnp.mean(h, axis=-1, keepdims=True)
    xc = h - mu
    var = jnp.mean(xc * xc, axis=-1, keepdims=True)
    return xc * jax.lax.rsqrt(var + eps) * g + b


def _erf(z):
    # Abramowitz & Stegun 7.1.26 polynomial erf (|err| <= 1.5e-7), built from
    # exp / mul / add / select plus an EUP reciprocal, so the VALU slot stays
    # light.  Close to HF BERT's exact (erf) GELU within normal f32 tolerance.
    # TODO(synk): try jax.lax.erf — if it lowers on Mosaic it is both faster
    # (single EUP op) and exact.
    a1, a2, a3, a4, a5 = (0.254829592, -0.284496736, 1.421413741,
                          -1.453152027, 1.061405429)
    p = 0.3275911
    sgn = jnp.where(z >= 0.0, 1.0, -1.0)
    az = jnp.abs(z)
    t = _fast_recip(1.0 + p * az)
    poly = ((((a5 * t + a4) * t + a3) * t + a2) * t + a1) * t
    return sgn * (1.0 - poly * jnp.exp(-az * az))


def _gelu_exact(x):
    return 0.5 * x * (1.0 + _erf(x * 0.7071067811865475))


# ------------------------------- fused kernel --------------------------------
def _tlm_kernel(emb_ref, mask_ref, eg_ref, eb_ref,
                wqkv_ref, bqkv_ref, wo_ref, bo_ref, ln1g_ref, ln1b_ref,
                w1_ref, b1_ref, w2_ref, b2_ref, ln2g_ref, ln2b_ref,
                o_ref, *, num_heads, eps):
    """Whole BERT forward for one batch row; grid = (batch, layer).

    The output block (this batch's (S, H) slab) stays resident in VMEM across
    the "arbitrary" layer axis and doubles as the layer-to-layer activation
    carry (read-modify-write accumulator pattern).
    """
    S, H = o_ref.shape
    head_dim = H // num_heads

    # Layer 0: seed the resident slab with LayerNorm(word + pos + type embeds).
    @pl.when(pl.program_id(1) == 0)
    def _():
        o_ref[...] = _layer_norm(emb_ref[...], eg_ref[...], eb_ref[...], eps)

    x = o_ref[...]                                            # (S, H) prev acts

    # Fused QKV projection (1/sqrt(head_dim) already folded into Q weights).
    qkv = (jnp.dot(x, wqkv_ref[...], preferred_element_type=jnp.float32)
           + bqkv_ref[...])                                   # (S, 3H)

    # Hoist the (1,S)->(S,S) mask broadcast out of the head loop (no CSE of
    # broadcast_in_dim inside the unrolled loop otherwise).
    mask_sq = jnp.broadcast_to(mask_ref[...], (S, S))

    # Attention: batch is a grid axis, so per program we only loop over heads.
    attn = jnp.zeros((S, H), jnp.float32)
    for h in range(num_heads):
        c0 = h * head_dim
        qh = qkv[:, c0:c0 + head_dim]                         # (S, D)
        kh = qkv[:, H + c0:H + c0 + head_dim]                 # (S, D)
        vh = qkv[:, 2 * H + c0:2 * H + c0 + head_dim]         # (S, D)
        s = jax.lax.dot_general(qh, kh, (((1,), (1,)), ((), ())),
                                preferred_element_type=jnp.float32)  # (S, S)
        s = s + mask_sq
        m = jnp.max(s, axis=-1, keepdims=True)
        p = jnp.exp(s - m)
        p = p * _fast_recip(jnp.sum(p, axis=-1, keepdims=True))  # EUP + Newton
        ctx = jnp.dot(p, vh, preferred_element_type=jnp.float32)  # (S, D)
        # Per-head slice of the output projection accumulated directly — same
        # flops as ctx_full @ wo but no (S, H) context scratch / masked stores.
        attn = attn + jnp.dot(ctx, wo_ref[c0:c0 + head_dim, :],
                              preferred_element_type=jnp.float32)

    x1 = _layer_norm(attn + bo_ref[...] + x, ln1g_ref[...], ln1b_ref[...], eps)

    # FFN with exact-erf GELU.
    hmid = (jnp.dot(x1, w1_ref[...], preferred_element_type=jnp.float32)
            + b1_ref[...])
    hmid = _gelu_exact(hmid)
    ffn = (jnp.dot(hmid, w2_ref[...], preferred_element_type=jnp.float32)
           + b2_ref[...])
    o_ref[...] = _layer_norm(ffn + x1, ln2g_ref[...], ln2b_ref[...], eps)
    # dropout layers are identity at inference (eval semantics)


# ------------------------------ model assembly ------------------------------
def tlm_forward(params, input_ids, token_type_ids, attention_mask):
    """Returns last_hidden_state of shape (B, S, HIDDEN), float32."""
    B, S = input_ids.shape
    H = HIDDEN

    # Embedding gathers are XLA glue; their sum feeds the in-kernel LayerNorm.
    word = params["word_emb"][input_ids]                      # (B, S, H)
    pos = params["pos_emb"][:S]                               # (S, H)
    typ = params["type_emb"][token_type_ids]                  # (B, S, H)
    emb = word + typ + pos[None, :, :]

    # Additive attention-mask bias, kept at (B, 1, S); broadcast in-kernel.
    # (-1e9 instead of finfo.min: identical for normal masks; fully-masked rows
    #  yield a uniform distribution, matching HF behavior.)
    mask_bias = ((1.0 - attention_mask.astype(jnp.float32)) * (-1e9)
                 ).reshape(B, 1, S)

    def batch_spec(shape):      # per-batch resident block
        return pl.BlockSpec((None,) + shape[1:], lambda b, l: (b, 0, 0))

    def shared_spec(shape):     # same block every step
        return pl.BlockSpec(shape, lambda b, l: (0,) * len(shape))

    def layer_spec(shape):      # stacked (L, ...) weight, selected by layer id
        return pl.BlockSpec((None,) + shape[1:], lambda b, l: (l, 0, 0))

    args = (emb, mask_bias, params["emb_ln_g"], params["emb_ln_b"],
            params["wqkv"], params["bqkv"], params["wo"], params["bo"],
            params["ln1_g"], params["ln1_b"], params["w1"], params["b1"],
            params["w2"], params["b2"], params["ln2_g"], params["ln2_b"])
    in_specs = [batch_spec(emb.shape), batch_spec(mask_bias.shape),
                shared_spec(params["emb_ln_g"].shape),
                shared_spec(params["emb_ln_b"].shape)]
    in_specs += [layer_spec(a.shape) for a in args[4:]]

    # TODO(synk): for H=768/S~512 configs, tile the token dim here and set
    # pltpu.CompilerParams(vmem_limit_bytes=...) explicitly.
    out = pl.pallas_call(
        functools.partial(_tlm_kernel, num_heads=NUM_HEADS, eps=LN_EPS),
        out_shape=jax.ShapeDtypeStruct((B, S, H), jnp.float32),
        grid=(B, NUM_LAYERS),
        in_specs=in_specs,
        out_specs=pl.BlockSpec((None, S, H), lambda b, l: (b, 0, 0)),
        compiler_params=pltpu.CompilerParams(
            dimension_semantics=("parallel", "arbitrary")),
    )(*args)
    return out


# ----------------------------- parameter init -------------------------------
def init_params(key):
    keys = iter(jax.random.split(key, 128))

    def n(shape):
        return INIT_RANGE * jax.random.normal(next(keys), shape, jnp.float32)

    scale = 1.0 / math.sqrt(HEAD_DIM)

    def one_layer():
        wq, wk, wv = n((HIDDEN, HIDDEN)), n((HIDDEN, HIDDEN)), n((HIDDEN, HIDDEN))
        bq = jnp.zeros((1, HIDDEN), jnp.float32)
        bk = jnp.zeros((1, HIDDEN), jnp.float32)
        bv = jnp.zeros((1, HIDDEN), jnp.float32)
        # Fold 1/sqrt(head_dim) into the Q projection (weight AND bias) so the
        # kernel never scales q at runtime.
        wqkv = jnp.concatenate([wq * scale, wk, wv], axis=1)   # (H, 3H)
        bqkv = jnp.concatenate([bq * scale, bk, bv], axis=1)   # (1, 3H)
        return {
            "wqkv": wqkv, "bqkv": bqkv,
            "wo": n((HIDDEN, HIDDEN)), "bo": jnp.zeros((1, HIDDEN), jnp.float32),
            "ln1_g": jnp.ones((1, HIDDEN), jnp.float32),
            "ln1_b": jnp.zeros((1, HIDDEN), jnp.float32),
            "w1": n((HIDDEN, INTERMEDIATE)),
            "b1": jnp.zeros((1, INTERMEDIATE), jnp.float32),
            "w2": n((INTERMEDIATE, HIDDEN)),
            "b2": jnp.zeros((1, HIDDEN), jnp.float32),
            "ln2_g": jnp.ones((1, HIDDEN), jnp.float32),
            "ln2_b": jnp.zeros((1, HIDDEN), jnp.float32),
        }

    layers = [one_layer() for _ in range(NUM_LAYERS)]
    # Stack per-layer weights along a leading layer axis for the layer grid.
    stacked = {k: jnp.stack([lp[k] for lp in layers], axis=0) for k in layers[0]}

    params = {
        "word_emb": n((VOCAB, HIDDEN)),
        "pos_emb": n((MAX_POS, HIDDEN)),
        "type_emb": n((TYPE_VOCAB, HIDDEN)),  # re-init N(0, init_range) as in TLM.__init__
        "emb_ln_g": jnp.ones((1, HIDDEN), jnp.float32),
        "emb_ln_b": jnp.zeros((1, HIDDEN), jnp.float32),
        **stacked,
    }
    # NOTE: TLM.__init__ also defines `self.linear`, which is unused in forward.
    return params


# ---------------------------------- main -------------------------------------
if __name__ == "__main__":
    key = jax.random.PRNGKey(0)
    pkey, ikey = jax.random.split(key)
    params = init_params(pkey)

    B, S = 2, 8
    input_ids = jax.random.randint(ikey, (B, S), 0, VOCAB, dtype=jnp.int32)
    token_type_ids = jnp.concatenate(
        [jnp.zeros((B, S // 2), jnp.int32), jnp.ones((B, S // 2), jnp.int32)],
        axis=1)
    attention_mask = jnp.ones((B, S), jnp.int32)

    fwd = jax.jit(tlm_forward)
    out = fwd(params, input_ids, token_type_ids, attention_mask)
    jax.block_until_ready(out)
    assert out.shape == (B, S, HIDDEN) and out.dtype == jnp.float32
    print("KERNEL_OK")
</pallas_src>

<mosaic_0001>
module attributes {stable_mosaic.version = 11 : i64} {
  func.func @_tlm_kernel(%arg0: i32, %arg1: i32, %arg2: memref<1x8x32xf32, #tpu.memory_space<vmem>>, %arg3: memref<1x1x8xf32, #tpu.memory_space<vmem>>, %arg4: memref<1x32xf32, #tpu.memory_space<vmem>>, %arg5: memref<1x32xf32, #tpu.memory_space<vmem>>, %arg6: memref<1x32x96xf32, #tpu.memory_space<vmem>>, %arg7: memref<1x1x96xf32, #tpu.memory_space<vmem>>, %arg8: memref<1x32x32xf32, #tpu.memory_space<vmem>>, %arg9: memref<1x1x32xf32, #tpu.memory_space<vmem>>, %arg10: memref<1x1x32xf32, #tpu.memory_space<vmem>>, %arg11: memref<1x1x32xf32, #tpu.memory_space<vmem>>, %arg12: memref<1x32x64xf32, #tpu.memory_space<vmem>>, %arg13: memref<1x1x64xf32, #tpu.memory_space<vmem>>, %arg14: memref<1x64x32xf32, #tpu.memory_space<vmem>>, %arg15: memref<1x1x32xf32, #tpu.memory_space<vmem>>, %arg16: memref<1x1x32xf32, #tpu.memory_space<vmem>>, %arg17: memref<1x1x32xf32, #tpu.memory_space<vmem>>, %arg18: memref<1x8x32xf32, #tpu.memory_space<vmem>>) attributes {dimension_semantics = [#tpu.dimension_semantics<parallel>, #tpu.dimension_semantics<arbitrary>], iteration_bounds = array<i64: 2, 2>, scalar_prefetch = 0 : i64, scratch_operands = 0 : i64, tpu.core_type = #tpu.core_type<tc>, window_params = [{transform_indices = @transform_0, window_bounds = array<i64: 1, 8, 32>}, {transform_indices = @transform_1, window_bounds = array<i64: 1, 1, 8>}, {pipeline_mode = #tpu.pipeline_mode<synchronous>, transform_indices = @transform_2, window_bounds = array<i64: 1, 32>}, {pipeline_mode = #tpu.pipeline_mode<synchronous>, transform_indices = @transform_3, window_bounds = array<i64: 1, 32>}, {transform_indices = @transform_4, window_bounds = array<i64: 1, 32, 96>}, {transform_indices = @transform_5, window_bounds = array<i64: 1, 1, 96>}, {transform_indices = @transform_6, window_bounds = array<i64: 1, 32, 32>}, {transform_indices = @transform_7, window_bounds = array<i64: 1, 1, 32>}, {transform_indices = @transform_8, window_bounds = array<i64: 1, 1, 32>}, {transform_indices = @transform_9, window_bounds = array<i64: 1, 1, 32>}, {transform_indices = @transform_10, window_bounds = array<i64: 1, 32, 64>}, {transform_indices = @transform_11, window_bounds = array<i64: 1, 1, 64>}, {transform_indices = @transform_12, window_bounds = array<i64: 1, 64, 32>}, {transform_indices = @transform_13, window_bounds = array<i64: 1, 1, 32>}, {transform_indices = @transform_14, window_bounds = array<i64: 1, 1, 32>}, {transform_indices = @transform_15, window_bounds = array<i64: 1, 1, 32>}, {transform_indices = @transform_16, window_bounds = array<i64: 1, 8, 32>}]} {
    %c0_i32 = arith.constant 0 : i32
    %0 = arith.cmpi eq, %arg1, %c0_i32 : i32
    %1 = arith.extui %0 : i1 to i32
    %c0_i32_0 = arith.constant 0 : i32
    %2 = arith.cmpi ne, %1, %c0_i32_0 : i32
    scf.if %2 {
      %c0_88 = arith.constant 0 : index
      %c0_89 = arith.constant 0 : index
      %c0_90 = arith.constant 0 : index
      %180 = vector.load %arg2[%c0_88, %c0_89, %c0_90] : memref<1x8x32xf32, #tpu.memory_space<vmem>>, vector<1x8x32xf32>
      %181 = vector.shape_cast %180 : vector<1x8x32xf32> to vector<8x32xf32>
      %c0_91 = arith.constant 0 : index
      %c0_92 = arith.constant 0 : index
      %182 = vector.load %arg4[%c0_91, %c0_92] : memref<1x32xf32, #tpu.memory_space<vmem>>, vector<1x32xf32>
      %c0_93 = arith.constant 0 : index
      %c0_94 = arith.constant 0 : index
      %183 = vector.load %arg5[%c0_93, %c0_94] : memref<1x32xf32, #tpu.memory_space<vmem>>, vector<1x32xf32>
      %cst_95 = arith.constant dense<0.000000e+00> : vector<8xf32>
      %184 = vector.multi_reduction <add>, %181, %cst_95 [1] : vector<8x32xf32> to vector<8xf32>
      %185 = vector.shape_cast %184 : vector<8xf32> to vector<8x1xf32>
      %cst_96 = arith.constant 3.200000e+01 : f32
      %186 = vector.broadcast %cst_96 : f32 to vector<8x1xf32>
      %187 = arith.divf %185, %186 : vector<8x1xf32>
      %188 = vector.broadcast %187 : vector<8x1xf32> to vector<8x32xf32>
      %189 = arith.subf %181, %188 : vector<8x32xf32>
      %190 = arith.mulf %189, %189 : vector<8x32xf32>
      %cst_97 = arith.constant dense<0.000000e+00> : vector<8xf32>
      %191 = vector.multi_reduction <add>, %190, %cst_97 [1] : vector<8x32xf32> to vector<8xf32>
      %192 = vector.shape_cast %191 : vector<8xf32> to vector<8x1xf32>
      %cst_98 = arith.constant 3.200000e+01 : f32
      %193 = vector.broadcast %cst_98 : f32 to vector<8x1xf32>
      %194 = arith.divf %192, %193 : vector<8x1xf32>
      %cst_99 = arith.constant 9.99999996E-13 : f32
      %195 = vector.broadcast %cst_99 : f32 to vector<8x1xf32>
      %196 = arith.addf %194, %195 : vector<8x1xf32>
      %197 = math.rsqrt %196 : vector<8x1xf32>
      %198 = vector.broadcast %197 : vector<8x1xf32> to vector<8x32xf32>
      %199 = arith.mulf %189, %198 : vector<8x32xf32>
      %200 = vector.broadcast %182 : vector<1x32xf32> to vector<8x32xf32>
      %201 = arith.mulf %199, %200 : vector<8x32xf32>
      %202 = vector.broadcast %183 : vector<1x32xf32> to vector<8x32xf32>
      %203 = arith.addf %201, %202 : vector<8x32xf32>
      %c0_100 = arith.constant 0 : index
      %c0_101 = arith.constant 0 : index
      %c0_102 = arith.constant 0 : index
      %204 = vector.load %arg18[%c0_100, %c0_101, %c0_102] : memref<1x8x32xf32, #tpu.memory_space<vmem>>, vector<1x8x32xf32>
      %205 = vector.shape_cast %204 : vector<1x8x32xf32> to vector<8x32xf32>
      %206 = vector.shape_cast %203 : vector<8x32xf32> to vector<1x8x32xf32>
      tpu.vector_store %arg18[%c0_100, %c0_101, %c0_102], %206 {strides = array<i32>} : memref<1x8x32xf32, #tpu.memory_space<vmem>>, vector<1x8x32xf32>,
    } else {
    }
    %c0 = arith.constant 0 : index
    %c0_1 = arith.constant 0 : index
    %c0_2 = arith.constant 0 : index
    %3 = vector.load %arg18[%c0, %c0_1, %c0_2] : memref<1x8x32xf32, #tpu.memory_space<vmem>>, vector<1x8x32xf32>
    %4 = vector.shape_cast %3 : vector<1x8x32xf32> to vector<8x32xf32>
    %c0_3 = arith.constant 0 : index
    %c0_4 = arith.constant 0 : index
    %c0_5 = arith.constant 0 : index
    %5 = vector.load %arg6[%c0_3, %c0_4, %c0_5] : memref<1x32x96xf32, #tpu.memory_space<vmem>>, vector<1x32x96xf32>
    %6 = vector.shape_cast %5 : vector<1x32x96xf32> to vector<32x96xf32>
    %cst = arith.constant dense<0.000000e+00> : vector<8x96xf32>
    %7 = tpu.matmul %4, %6, %cst {dimension_numbers = #tpu.dot_dimension_numbers<[1], [0], [0], [1], [0, 0, 1, 1], [], []>} : vector<8x32xf32>, vector<32x96xf32>, vector<8x96xf32> -> vector<8x96xf32>
    %c0_6 = arith.constant 0 : index
    %c0_7 = arith.constant 0 : index
    %c0_8 = arith.constant 0 : index
    %8 = vector.load %arg7[%c0_6, %c0_7, %c0_8] : memref<1x1x96xf32, #tpu.memory_space<vmem>>, vector<1x1x96xf32>
    %9 = vector.shape_cast %8 : vector<1x1x96xf32> to vector<1x96xf32>
    %10 = vector.broadcast %9 : vector<1x96xf32> to vector<8x96xf32>
    %11 = arith.addf %7, %10 : vector<8x96xf32>
    %c0_9 = arith.constant 0 : index
    %c0_10 = arith.constant 0 : index
    %c0_11 = arith.constant 0 : index
    %12 = vector.load %arg3[%c0_9, %c0_10, %c0_11] : memref<1x1x8xf32, #tpu.memory_space<vmem>>, vector<1x1x8xf32>
    %13 = vector.shape_cast %12 : vector<1x1x8xf32> to vector<1x8xf32>
    %14 = vector.shape_cast %13 : vector<1x8xf32> to vector<1x8xf32>
    %15 = vector.broadcast %14 : vector<1x8xf32> to vector<8x8xf32>
    %cst_12 = arith.constant 0.000000e+00 : f32
    %16 = vector.broadcast %cst_12 : f32 to vector<8x32xf32>
    %17 = vector.extract_strided_slice %11 {offsets = [0, 0], sizes = [8, 16], strides = [1, 1]} : vector<8x96xf32> to vector<8x16xf32>
    %18 = vector.extract_strided_slice %11 {offsets = [0, 32], sizes = [8, 16], strides = [1, 1]} : vector<8x96xf32> to vector<8x16xf32>
    %19 = vector.extract_strided_slice %11 {offsets = [0, 64], sizes = [8, 16], strides = [1, 1]} : vector<8x96xf32> to vector<8x16xf32>
    %cst_13 = arith.constant dense<0.000000e+00> : vector<8x8xf32>
    %20 = tpu.matmul %17, %18, %cst_13 {dimension_numbers = #tpu.dot_dimension_numbers<[1], [1], [0], [0], [0, 0, 1, 0], [], []>} : vector<8x16xf32>, vector<8x16xf32>, vector<8x8xf32> -> vector<8x8xf32>
    %21 = arith.addf %20, %15 : vector<8x8xf32>
    %cst_14 = arith.constant dense<0xFF800000> : vector<8xf32>
    %22 = vector.multi_reduction <maximumf>, %21, %cst_14 [1] : vector<8x8xf32> to vector<8xf32>
    %23 = vector.shape_cast %22 : vector<8xf32> to vector<8x1xf32>
    %24 = vector.broadcast %23 : vector<8x1xf32> to vector<8x8xf32>
    %25 = arith.subf %21, %24 : vector<8x8xf32>
    %26 = math.exp %25 : vector<8x8xf32>
    %cst_15 = arith.constant dense<0.000000e+00> : vector<8xf32>
    %27 = vector.multi_reduction <add>, %26, %cst_15 [1] : vector<8x8xf32> to vector<8xf32>
    %28 = vector.shape_cast %27 : vector<8xf32> to vector<8x1xf32>
    %29 = tpu.reciprocal %28 {approx = true} : vector<8x1xf32> -> vector<8x1xf32>
    %30 = arith.mulf %28, %29 : vector<8x1xf32>
    %cst_16 = arith.constant 2.000000e+00 : f32
    %31 = vector.broadcast %cst_16 : f32 to vector<8x1xf32>
    %32 = arith.subf %31, %30 : vector<8x1xf32>
    %33 = arith.mulf %29, %32 : vector<8x1xf32>
    %34 = vector.broadcast %33 : vector<8x1xf32> to vector<8x8xf32>
    %35 = arith.mulf %26, %34 : vector<8x8xf32>
    %cst_17 = arith.constant dense<0.000000e+00> : vector<8x16xf32>
    %36 = tpu.matmul %35, %19, %cst_17 {dimension_numbers = #tpu.dot_dimension_numbers<[1], [0], [0], [1], [0, 0, 1, 1], [], []>} : vector<8x8xf32>, vector<8x16xf32>, vector<8x16xf32> -> vector<8x16xf32>
    %c0_18 = arith.constant 0 : index
    %c0_19 = arith.constant 0 : index
    %c0_20 = arith.constant 0 : index
    %37 = vector.load %arg8[%c0_18, %c0_19, %c0_20] : memref<1x32x32xf32, #tpu.memory_space<vmem>>, vector<1x16x32xf32>
    %38 = vector.shape_cast %37 : vector<1x16x32xf32> to vector<16x32xf32>
    %cst_21 = arith.constant dense<0.000000e+00> : vector<8x32xf32>
    %39 = tpu.matmul %36, %38, %cst_21 {dimension_numbers = #tpu.dot_dimension_numbers<[1], [0], [0], [1], [0, 0, 1, 1], [], []>} : vector<8x16xf32>, vector<16x32xf32>, vector<8x32xf32> -> vector<8x32xf32>
    %40 = arith.addf %16, %39 : vector<8x32xf32>
    %41 = vector.extract_strided_slice %11 {offsets = [0, 16], sizes = [8, 16], strides = [1, 1]} : vector<8x96xf32> to vector<8x16xf32>
    %42 = vector.extract_strided_slice %11 {offsets = [0, 48], sizes = [8, 16], strides = [1, 1]} : vector<8x96xf32> to vector<8x16xf32>
    %43 = vector.extract_strided_slice %11 {offsets = [0, 80], sizes = [8, 16], strides = [1, 1]} : vector<8x96xf32> to vector<8x16xf32>
    %cst_22 = arith.constant dense<0.000000e+00> : vector<8x8xf32>
    %44 = tpu.matmul %41, %42, %cst_22 {dimension_numbers = #tpu.dot_dimension_numbers<[1], [1], [0], [0], [0, 0, 1, 0], [], []>} : vector<8x16xf32>, vector<8x16xf32>, vector<8x8xf32> -> vector<8x8xf32>
    %45 = arith.addf %44, %15 : vector<8x8xf32>
    %cst_23 = arith.constant dense<0xFF800000> : vector<8xf32>
    %46 = vector.multi_reduction <maximumf>, %45, %cst_23 [1] : vector<8x8xf32> to vector<8xf32>
    %47 = vector.shape_cast %46 : vector<8xf32> to vector<8x1xf32>
    %48 = vector.broadcast %47 : vector<8x1xf32> to vector<8x8xf32>
    %49 = arith.subf %45, %48 : vector<8x8xf32>
    %50 = math.exp %49 : vector<8x8xf32>
    %cst_24 = arith.constant dense<0.000000e+00> : vector<8xf32>
    %51 = vector.multi_reduction <add>, %50, %cst_24 [1] : vector<8x8xf32> to vector<8xf32>
    %52 = vector.shape_cast %51 : vector<8xf32> to vector<8x1xf32>
    %53 = tpu.reciprocal %52 {approx = true} : vector<8x1xf32> -> vector<8x1xf32>
    %54 = arith.mulf %52, %53 : vector<8x1xf32>
    %cst_25 = arith.constant 2.000000e+00 : f32
    %55 = vector.broadcast %cst_25 : f32 to vector<8x1xf32>
    %56 = arith.subf %55, %54 : vector<8x1xf32>
    %57 = arith.mulf %53, %56 : vector<8x1xf32>
    %58 = vector.broadcast %57 : vector<8x1xf32> to vector<8x8xf32>
    %59 = arith.mulf %50, %58 : vector<8x8xf32>
    %cst_26 = arith.constant dense<0.000000e+00> : vector<8x16xf32>
    %60 = tpu.matmul %59, %43, %cst_26 {dimension_numbers = #tpu.dot_dimension_numbers<[1], [0], [0], [1], [0, 0, 1, 1], [], []>} : vector<8x8xf32>, vector<8x16xf32>, vector<8x16xf32> -> vector<8x16xf32>
    %c0_27 = arith.constant 0 : index
    %c16 = arith.constant 16 : index
    %c0_28 = arith.constant 0 : index
    %61 = vector.load %arg8[%c0_27, %c16, %c0_28] : memref<1x32x32xf32, #tpu.memory_space<vmem>>, vector<1x16x32xf32>
    %62 = vector.shape_cast %61 : vector<1x16x32xf32> to vector<16x32xf32>
    %cst_29 = arith.constant dense<0.000000e+00> : vector<8x32xf32>
    %63 = tpu.matmul %60, %62, %cst_29 {dimension_numbers = #tpu.dot_dimension_numbers<[1], [0], [0], [1], [0, 0, 1, 1], [], []>} : vector<8x16xf32>, vector<16x32xf32>, vector<8x32xf32> -> vector<8x32xf32>
    %64 = arith.addf %40, %63 : vector<8x32xf32>
    %c0_30 = arith.constant 0 : index
    %c0_31 = arith.constant 0 : index
    %c0_32 = arith.constant 0 : index
    %65 = vector.load %arg9[%c0_30, %c0_31, %c0_32] : memref<1x1x32xf32, #tpu.memory_space<vmem>>, vector<1x1x32xf32>
    %66 = vector.shape_cast %65 : vector<1x1x32xf32> to vector<1x32xf32>
    %67 = vector.broadcast %66 : vector<1x32xf32> to vector<8x32xf32>
    %68 = arith.addf %64, %67 : vector<8x32xf32>
    %69 = arith.addf %68, %4 : vector<8x32xf32>
    %c0_33 = arith.constant 0 : index
    %c0_34 = arith.constant 0 : index
    %c0_35 = arith.constant 0 : index
    %70 = vector.load %arg10[%c0_33, %c0_34, %c0_35] : memref<1x1x32xf32, #tpu.memory_space<vmem>>, vector<1x1x32xf32>
    %71 = vector.shape_cast %70 : vector<1x1x32xf32> to vector<1x32xf32>
    %c0_36 = arith.constant 0 : index
    %c0_37 = arith.constant 0 : index
    %c0_38 = arith.constant 0 : index
    %72 = vector.load %arg11[%c0_36, %c0_37, %c0_38] : memref<1x1x32xf32, #tpu.memory_space<vmem>>, vector<1x1x32xf32>
    %73 = vector.shape_cast %72 : vector<1x1x32xf32> to vector<1x32xf32>
    %cst_39 = arith.constant dense<0.000000e+00> : vector<8xf32>
    %74 = vector.multi_reduction <add>, %69, %cst_39 [1] : vector<8x32xf32> to vector<8xf32>
    %75 = vector.shape_cast %74 : vector<8xf32> to vector<8x1xf32>
    %cst_40 = arith.constant 3.200000e+01 : f32
    %76 = vector.broadcast %cst_40 : f32 to vector<8x1xf32>
    %77 = arith.divf %75, %76 : vector<8x1xf32>
    %78 = vector.broadcast %77 : vector<8x1xf32> to vector<8x32xf32>
    %79 = arith.subf %69, %78 : vector<8x32xf32>
    %80 = arith.mulf %79, %79 : vector<8x32xf32>
    %cst_41 = arith.constant dense<0.000000e+00> : vector<8xf32>
    %81 = vector.multi_reduction <add>, %80, %cst_41 [1] : vector<8x32xf32> to vector<8xf32>
    %82 = vector.shape_cast %81 : vector<8xf32> to vector<8x1xf32>
    %cst_42 = arith.constant 3.200000e+01 : f32
    %83 = vector.broadcast %cst_42 : f32 to vector<8x1xf32>
    %84 = arith.divf %82, %83 : vector<8x1xf32>
    %cst_43 = arith.constant 9.99999996E-13 : f32
    %85 = vector.broadcast %cst_43 : f32 to vector<8x1xf32>
    %86 = arith.addf %84, %85 : vector<8x1xf32>
    %87 = math.rsqrt %86 : vector<8x1xf32>
    %88 = vector.broadcast %87 : vector<8x1xf32> to vector<8x32xf32>
    %89 = arith.mulf %79, %88 : vector<8x32xf32>
    %90 = vector.broadcast %71 : vector<1x32xf32> to vector<8x32xf32>
    %91 = arith.mulf %89, %90 : vector<8x32xf32>
    %92 = vector.broadcast %73 : vector<1x32xf32> to vector<8x32xf32>
    %93 = arith.addf %91, %92 : vector<8x32xf32>
    %c0_44 = arith.constant 0 : index
    %c0_45 = arith.constant 0 : index
    %c0_46 = arith.constant 0 : index
    %94 = vector.load %arg12[%c0_44, %c0_45, %c0_46] : memref<1x32x64xf32, #tpu.memory_space<vmem>>, vector<1x32x64xf32>
    %95 = vector.shape_cast %94 : vector<1x32x64xf32> to vector<32x64xf32>
    %cst_47 = arith.constant dense<0.000000e+00> : vector<8x64xf32>
    %96 = tpu.matmul %93, %95, %cst_47 {dimension_numbers = #tpu.dot_dimension_numbers<[1], [0], [0], [1], [0, 0, 1, 1], [], []>} : vector<8x32xf32>, vector<32x64xf32>, vector<8x64xf32> -> vector<8x64xf32>
    %c0_48 = arith.constant 0 : index
    %c0_49 = arith.constant 0 : index
    %c0_50 = arith.constant 0 : index
    %97 = vector.load %arg13[%c0_48, %c0_49, %c0_50] : memref<1x1x64xf32, #tpu.memory_space<vmem>>, vector<1x1x64xf32>
    %98 = vector.shape_cast %97 : vector<1x1x64xf32> to vector<1x64xf32>
    %99 = vector.broadcast %98 : vector<1x64xf32> to vector<8x64xf32>
    %100 = arith.addf %96, %99 : vector<8x64xf32>
    %cst_51 = arith.constant 5.000000e-01 : f32
    %101 = vector.broadcast %cst_51 : f32 to vector<8x64xf32>
    %102 = arith.mulf %101, %100 : vector<8x64xf32>
    %cst_52 = arith.constant 0.707106769 : f32
    %103 = vector.broadcast %cst_52 : f32 to vector<8x64xf32>
    %104 = arith.mulf %100, %103 : vector<8x64xf32>
    %cst_53 = arith.constant 0.000000e+00 : f32
    %105 = vector.broadcast %cst_53 : f32 to vector<8x64xf32>
    %106 = arith.cmpf oge, %104, %105 : vector<8x64xf32>
    %cst_54 = arith.constant 1.000000e+00 : f32
    %cst_55 = arith.constant -1.000000e+00 : f32
    %107 = vector.broadcast %cst_54 : f32 to vector<8x64xf32>
    %108 = vector.broadcast %cst_55 : f32 to vector<8x64xf32>
    %109 = arith.select %106, %107, %108 : vector<8x64xi1>, vector<8x64xf32>
    %110 = math.absf %104 : vector<8x64xf32>
    %cst_56 = arith.constant 0.327591091 : f32
    %111 = vector.broadcast %cst_56 : f32 to vector<8x64xf32>
    %112 = arith.mulf %111, %110 : vector<8x64xf32>
    %cst_57 = arith.constant 1.000000e+00 : f32
    %113 = vector.broadcast %cst_57 : f32 to vector<8x64xf32>
    %114 = arith.addf %113, %112 : vector<8x64xf32>
    %115 = tpu.reciprocal %114 {approx = true} : vector<8x64xf32> -> vector<8x64xf32>
    %116 = arith.mulf %114, %115 : vector<8x64xf32>
    %cst_58 = arith.constant 2.000000e+00 : f32
    %117 = vector.broadcast %cst_58 : f32 to vector<8x64xf32>
    %118 = arith.subf %117, %116 : vector<8x64xf32>
    %119 = arith.mulf %115, %118 : vector<8x64xf32>
    %cst_59 = arith.constant 1.06140542 : f32
    %120 = vector.broadcast %cst_59 : f32 to vector<8x64xf32>
    %121 = arith.mulf %120, %119 : vector<8x64xf32>
    %cst_60 = arith.constant -1.45315206 : f32
    %122 = vector.broadcast %cst_60 : f32 to vector<8x64xf32>
    %123 = arith.addf %121, %122 : vector<8x64xf32>
    %124 = arith.mulf %123, %119 : vector<8x64xf32>
    %cst_61 = arith.constant 1.42141378 : f32
    %125 = vector.broadcast %cst_61 : f32 to vector<8x64xf32>
    %126 = arith.addf %124, %125 : vector<8x64xf32>
    %127 = arith.mulf %126, %119 : vector<8x64xf32>
    %cst_62 = arith.constant -0.284496725 : f32
    %128 = vector.broadcast %cst_62 : f32 to vector<8x64xf32>
    %129 = arith.addf %127, %128 : vector<8x64xf32>
    %130 = arith.mulf %129, %119 : vector<8x64xf32>
    %cst_63 = arith.constant 0.254829586 : f32
    %131 = vector.broadcast %cst_63 : f32 to vector<8x64xf32>
    %132 = arith.addf %130, %131 : vector<8x64xf32>
    %133 = arith.mulf %132, %119 : vector<8x64xf32>
    %cst_64 = arith.constant 0.000000e+00 : f32
    %134 = vector.broadcast %cst_64 : f32 to vector<8x64xf32>
    %135 = arith.subf %134, %110 : vector<8x64xf32>
    %136 = arith.mulf %135, %110 : vector<8x64xf32>
    %137 = math.exp %136 : vector<8x64xf32>
    %138 = arith.mulf %133, %137 : vector<8x64xf32>
    %cst_65 = arith.constant 1.000000e+00 : f32
    %139 = vector.broadcast %cst_65 : f32 to vector<8x64xf32>
    %140 = arith.subf %139, %138 : vector<8x64xf32>
    %141 = arith.mulf %109, %140 : vector<8x64xf32>
    %cst_66 = arith.constant 1.000000e+00 : f32
    %142 = vector.broadcast %cst_66 : f32 to vector<8x64xf32>
    %143 = arith.addf %142, %141 : vector<8x64xf32>
    %144 = arith.mulf %102, %143 : vector<8x64xf32>
    %c0_67 = arith.constant 0 : index
    %c0_68 = arith.constant 0 : index
    %c0_69 = arith.constant 0 : index
    %145 = vector.load %arg14[%c0_67, %c0_68, %c0_69] : memref<1x64x32xf32, #tpu.memory_space<vmem>>, vector<1x64x32xf32>
    %146 = vector.shape_cast %145 : vector<1x64x32xf32> to vector<64x32xf32>
    %cst_70 = arith.constant dense<0.000000e+00> : vector<8x32xf32>
    %147 = tpu.matmul %144, %146, %cst_70 {dimension_numbers = #tpu.dot_dimension_numbers<[1], [0], [0], [1], [0, 0, 1, 1], [], []>} : vector<8x64xf32>, vector<64x32xf32>, vector<8x32xf32> -> vector<8x32xf32>
    %c0_71 = arith.constant 0 : index
    %c0_72 = arith.constant 0 : index
    %c0_73 = arith.constant 0 : index
    %148 = vector.load %arg15[%c0_71, %c0_72, %c0_73] : memref<1x1x32xf32, #tpu.memory_space<vmem>>, vector<1x1x32xf32>
    %149 = vector.shape_cast %148 : vector<1x1x32xf32> to vector<1x32xf32>
    %150 = vector.broadcast %149 : vector<1x32xf32> to vector<8x32xf32>
    %151 = arith.addf %147, %150 : vector<8x32xf32>
    %152 = arith.addf %151, %93 : vector<8x32xf32>
    %c0_74 = arith.constant 0 : index
    %c0_75 = arith.constant 0 : index
    %c0_76 = arith.constant 0 : index
    %153 = vector.load %arg16[%c0_74, %c0_75, %c0_76] : memref<1x1x32xf32, #tpu.memory_space<vmem>>, vector<1x1x32xf32>
    %154 = vector.shape_cast %153 : vector<1x1x32xf32> to vector<1x32xf32>
    %c0_77 = arith.constant 0 : index
    %c0_78 = arith.constant 0 : index
    %c0_79 = arith.constant 0 : index
    %155 = vector.load %arg17[%c0_77, %c0_78, %c0_79] : memref<1x1x32xf32, #tpu.memory_space<vmem>>, vector<1x1x32xf32>
    %156 = vector.shape_cast %155 : vector<1x1x32xf32> to vector<1x32xf32>
    %cst_80 = arith.constant dense<0.000000e+00> : vector<8xf32>
    %157 = vector.multi_reduction <add>, %152, %cst_80 [1] : vector<8x32xf32> to vector<8xf32>
    %158 = vector.shape_cast %157 : vector<8xf32> to vector<8x1xf32>
    %cst_81 = arith.constant 3.200000e+01 : f32
    %159 = vector.broadcast %cst_81 : f32 to vector<8x1xf32>
    %160 = arith.divf %158, %159 : vector<8x1xf32>
    %161 = vector.broadcast %160 : vector<8x1xf32> to vector<8x32xf32>
    %162 = arith.subf %152, %161 : vector<8x32xf32>
    %163 = arith.mulf %162, %162 : vector<8x32xf32>
    %cst_82 = arith.constant dense<0.000000e+00> : vector<8xf32>
    %164 = vector.multi_reduction <add>, %163, %cst_82 [1] : vector<8x32xf32> to vector<8xf32>
    %165 = vector.shape_cast %164 : vector<8xf32> to vector<8x1xf32>
    %cst_83 = arith.constant 3.200000e+01 : f32
    %166 = vector.broadcast %cst_83 : f32 to vector<8x1xf32>
    %167 = arith.divf %165, %166 : vector<8x1xf32>
    %cst_84 = arith.constant 9.99999996E-13 : f32
    %168 = vector.broadcast %cst_84 : f32 to vector<8x1xf32>
    %169 = arith.addf %167, %168 : vector<8x1xf32>
    %170 = math.rsqrt %169 : vector<8x1xf32>
    %171 = vector.broadcast %170 : vector<8x1xf32> to vector<8x32xf32>
    %172 = arith.mulf %162, %171 : vector<8x32xf32>
    %173 = vector.broadcast %154 : vector<1x32xf32> to vector<8x32xf32>
    %174 = arith.mulf %172, %173 : vector<8x32xf32>
    %175 = vector.broadcast %156 : vector<1x32xf32> to vector<8x32xf32>
    %176 = arith.addf %174, %175 : vector<8x32xf32>
    %c0_85 = arith.constant 0 : index
    %c0_86 = arith.constant 0 : index
    %c0_87 = arith.constant 0 : index
    %177 = vector.load %arg18[%c0_85, %c0_86, %c0_87] : memref<1x8x32xf32, #tpu.memory_space<vmem>>, vector<1x8x32xf32>
    %178 = vector.shape_cast %177 : vector<1x8x32xf32> to vector<8x32xf32>
    %179 = vector.shape_cast %176 : vector<8x32xf32> to vector<1x8x32xf32>
    tpu.vector_store %arg18[%c0_85, %c0_86, %c0_87], %179 {strides = array<i32>} : memref<1x8x32xf32, #tpu.memory_space<vmem>>, vector<1x8x32xf32>,
    return
  }
  func.func @transform_0(%arg0: i32, %arg1: i32) -> (i32, i32, i32) {
    %c0_i32 = arith.constant 0 : i32
    %c0_i32_0 = arith.constant 0 : i32
    %c0_i32_1 = arith.constant 0 : i32
    return %arg0, %c0_i32, %c0_i32_0 : i32, i32, i32
  }
  func.func @transform_1(%arg0: i32, %arg1: i32) -> (i32, i32, i32) {
    %c0_i32 = arith.constant 0 : i32
    %c0_i32_0 = arith.constant 0 : i32
    %c0_i32_1 = arith.constant 0 : i32
    return %arg0, %c0_i32, %c0_i32_0 : i32, i32, i32
  }
  func.func @transform_2(%arg0: i32, %arg1: i32) -> (i32, i32) {
    %c0_i32 = arith.constant 0 : i32
    %c0_i32_0 = arith.constant 0 : i32
    %c0_i32_1 = arith.constant 0 : i32
    return %c0_i32, %c0_i32_0 : i32, i32
  }
  func.func @transform_3(%arg0: i32, %arg1: i32) -> (i32, i32) {
    %c0_i32 = arith.constant 0 : i32
    %c0_i32_0 = arith.constant 0 : i32
    %c0_i32_1 = arith.constant 0 : i32
    return %c0_i32, %c0_i32_0 : i32, i32
  }
  func.func @transform_4(%arg0: i32, %arg1: i32) -> (i32, i32, i32) {
    %c0_i32 = arith.constant 0 : i32
    %c0_i32_0 = arith.constant 0 : i32
    %c0_i32_1 = arith.constant 0 : i32
    return %arg1, %c0_i32, %c0_i32_0 : i32, i32, i32
  }
  func.func @transform_5(%arg0: i32, %arg1: i32) -> (i32, i32, i32) {
    %c0_i32 = arith.constant 0 : i32
    %c0_i32_0 = arith.constant 0 : i32
    %c0_i32_1 = arith.constant 0 : i32
    return %arg1, %c0_i32, %c0_i32_0 : i32, i32, i32
  }
  func.func @transform_6(%arg0: i32, %arg1: i32) -> (i32, i32, i32) {
    %c0_i32 = arith.constant 0 : i32
    %c0_i32_0 = arith.constant 0 : i32
    %c0_i32_1 = arith.constant 0 : i32
    return %arg1, %c0_i32, %c0_i32_0 : i32, i32, i32
  }
  func.func @transform_7(%arg0: i32, %arg1: i32) -> (i32, i32, i32) {
    %c0_i32 = arith.constant 0 : i32
    %c0_i32_0 = arith.constant 0 : i32
    %c0_i32_1 = arith.constant 0 : i32
    return %arg1, %c0_i32, %c0_i32_0 : i32, i32, i32
  }
  func.func @transform_8(%arg0: i32, %arg1: i32) -> (i32, i32, i32) {
    %c0_i32 = arith.constant 0 : i32
    %c0_i32_0 = arith.constant 0 : i32
    %c0_i32_1 = arith.constant 0 : i32
    return %arg1, %c0_i32, %c0_i32_0 : i32, i32, i32
  }
  func.func @transform_9(%arg0: i32, %arg1: i32) -> (i32, i32, i32) {
    %c0_i32 = arith.constant 0 : i32
    %c0_i32_0 = arith.constant 0 : i32
    %c0_i32_1 = arith.constant 0 : i32
    return %arg1, %c0_i32, %c0_i32_0 : i32, i32, i32
  }
  func.func @transform_10(%arg0: i32, %arg1: i32) -> (i32, i32, i32) {
    %c0_i32 = arith.constant 0 : i32
    %c0_i32_0 = arith.constant 0 : i32
    %c0_i32_1 = arith.constant 0 : i32
    return %arg1, %c0_i32, %c0_i32_0 : i32, i32, i32
  }
  func.func @transform_11(%arg0: i32, %arg1: i32) -> (i32, i32, i32) {
    %c0_i32 = arith.constant 0 : i32
    %c0_i32_0 = arith.constant 0 : i32
    %c0_i32_1 = arith.constant 0 : i32
    return %arg1, %c0_i32, %c0_i32_0 : i32, i32, i32
  }
  func.func @transform_12(%arg0: i32, %arg1: i32) -> (i32, i32, i32) {
    %c0_i32 = arith.constant 0 : i32
    %c0_i32_0 = arith.constant 0 : i32
    %c0_i32_1 = arith.constant 0 : i32
    return %arg1, %c0_i32, %c0_i32_0 : i32, i32, i32
  }
  func.func @transform_13(%arg0: i32, %arg1: i32) -> (i32, i32, i32) {
    %c0_i32 = arith.constant 0 : i32
    %c0_i32_0 = arith.constant 0 : i32
    %c0_i32_1 = arith.constant 0 : i32
    return %arg1, %c0_i32, %c0_i32_0 : i32, i32, i32
  }
  func.func @transform_14(%arg0: i32, %arg1: i32) -> (i32, i32, i32) {
    %c0_i32 = arith.constant 0 : i32
    %c0_i32_0 = arith.constant 0 : i32
    %c0_i32_1 = arith.constant 0 : i32
    return %arg1, %c0_i32, %c0_i32_0 : i32, i32, i32
  }
  func.func @transform_15(%arg0: i32, %arg1: i32) -> (i32, i32, i32) {
    %c0_i32 = arith.constant 0 : i32
    %c0_i32_0 = arith.constant 0 : i32
    %c0_i32_1 = arith.constant 0 : i32
    return %arg1, %c0_i32, %c0_i32_0 : i32, i32, i32
  }
  func.func @transform_16(%arg0: i32, %arg1: i32) -> (i32, i32, i32) {
    %c0_i32 = arith.constant 0 : i32
    %c0_i32_0 = arith.constant 0 : i32
    %c0_i32_1 = arith.constant 0 : i32
    return %arg0, %c0_i32, %c0_i32_0 : i32, i32, i32
  }
}

</mosaic_0001>

<bundles_post_ra>
// kernel: tlm_forward.1
= control target key start
LH: loop header
LB: loop body
LE: loop exit
PB: predicated region body
PF: predicated region fallthrough
CT: control target
= control target key end

     0   :  { %s2651_s0 = inlined_call_operand.vmem [shape: f32[2,8,32], index: 0, kind: input, shape index: {}]   ;;  %s2652_s1 = inlined_call_operand.vmem [shape: f32[2,1,8], index: 1, kind: input, shape index: {}]   ;;  %s2653_s2 = inlined_call_operand.vmem [shape: f32[1,32], index: 2, kind: input, shape index: {}]   ;;  %s2654_s3 = inlined_call_operand.vmem [shape: f32[1,32], index: 3, kind: input, shape index: {}]   ;;  %s2655_s4 = inlined_call_operand.vmem [shape: f32[2,32,96], index: 4, kind: input, shape index: {}]   ;;  %s2656_s5 = inlined_call_operand.vmem [shape: f32[2,1,96], index: 5, kind: input, shape index: {}]   ;;  %s2657_s6 = inlined_call_operand.vmem [shape: f32[2,32,32], index: 6, kind: input, shape index: {}]   ;;  %s2658_s7 = inlined_call_operand.vmem [shape: f32[2,1,32], index: 7, kind: input, shape index: {}]   ;;  %s2659_s8 = inlined_call_operand.vmem [shape: f32[2,1,32], index: 8, kind: input, shape index: {}]   ;;  %s2660_s9 = inlined_call_operand.vmem [shape: f32[2,1,32], index: 9, kind: input, shape index: {}]   ;;  %s2661_s10 = inlined_call_operand.vmem [shape: f32[2,32,64], index: 10, kind: input, shape index: {}]   ;;  %s2662_s11 = inlined_call_operand.vmem [shape: f32[2,1,64], index: 11, kind: input, shape index: {}]   ;;  %s2663_s12 = inlined_call_operand.vmem [shape: f32[2,64,32], index: 12, kind: input, shape index: {}]   ;;  %s2664_s13 = inlined_call_operand.vmem [shape: f32[2,1,32], index: 13, kind: input, shape index: {}]   ;;  %s2665_s14 = inlined_call_operand.vmem [shape: f32[2,1,32], index: 14, kind: input, shape index: {}]   ;;  %s2666_s15 = inlined_call_operand.vmem [shape: f32[2,1,32], index: 15, kind: input, shape index: {}]   ;;  %s2667_s16 = inlined_call_operand.hbm [shape: f32[2,8,32], index: 16, kind: output, shape index: {}]  }
   0x1   :  { %2683 = sst [smem:[#allocation18_spill]] %s2651_s0 }
   0x2   :  { %2684 = sst [smem:[#allocation19_spill]] %s2652_s1 }
   0x3   :  { %2685 = sst [smem:[#allocation20_spill]] %s2653_s2 }
   0x4   :  { %2686 = sst [smem:[#allocation21_spill]] %s2654_s3 }
   0x5   :  { %2687 = sst [smem:[#allocation22_spill]] %s2655_s4 }
   0x6   :  { %2688 = sst [smem:[#allocation23_spill]] %s2657_s6 }
   0x7   :  { %2689 = sst [smem:[#allocation24_spill]] %s2660_s9 }
   0x8   :  { %2690 = sst [smem:[#allocation25_spill]] %s2661_s10 }
   0x9   :  { %2691 = sst [smem:[#allocation26_spill]] %s2665_s14 }
   0xa   :  { %2692 = sst [smem:[#allocation27_spill]] %s2666_s15 }
   0xb   :  { %2693 = sst [smem:[#allocation28_spill]] %s2667_s16 }
   0xc   :  { %21 = vsyncpa [#allocation3], 0 }
   0xd   :  { %23 = vsyncpa [#allocation3 + $0x1], 0  ;;  %s2310_s21 = smov 0   ;;  %s2312_s22 = smov 0  }
   0xe   :  { %s2314_s23 = smov 0   ;;  %s2316_s24 = smov 0  }
   0xf   :  { %s2318_s25 = smov 0   ;;  %s2320_s26 = smov 0  }
  0x10   :  { %s2322_s27 = smov 0   ;;  %s2324_s28 = smov 0  }
  0x11 LB: > { %2694 = sst [smem:[#allocation5_spill]] %s2185_s21  ;;  %s1837_s29 = sadd.s32 4294967295, %s2213_s28   ;;  %s2213_s28 = sphi %s2324_s28, %s29_s28   ;;  %s2209_s27 = sphi %s2322_s27, %s2743_s27   ;;  %s2205_s26 = sphi %s2320_s26, %s2742_s26   ;;  %s2201_s25 = sphi %s2318_s25, %s2741_s25   ;;  %s2197_s24 = sphi %s2316_s24, %s2740_s24   ;;  %s2193_s23 = sphi %s2314_s23, %s2739_s23   ;;  %s2189_s22 = sphi %s2312_s22, %s2738_s22   ;;  %s2185_s21 = sphi %s2310_s21, %s2737_s21  }
  0x12   : > { %2695 = sst [smem:[#allocation6_spill]] %s2189_s22  ;;  %s1838_s30 = sadd.s32 4294967294, %s2213_s28  }
  0x13   : > { %2696 = sst [smem:[#allocation7_spill]] %s2193_s23  ;;  %s38_s0 = sadd.s32 1, %s2205_s26 }
  0x14   : > { %2697 = sst [smem:[#allocation8_spill]] %s2197_s24  ;;  %p39_p0 = scmp.ge.s32.totalorder %s38_s0, 2 }
  0x15   : > { %2698 = sst [smem:[#allocation9_spill]] %s2201_s25  ;;  %s41_s17 = sadd.s32 1, %s2209_s27 }
  0x16   : > { %2699 = sst [smem:[#allocation10_spill]] %s2205_s26  ;;  %p464_p1 = scmp.ne.s32.totalorder %s2193_s23, %s2189_s22 }
  0x17   : > { %2700 = sst [smem:[#allocation11_spill]] %s2209_s27  ;;  %p465_p2 = scmp.eq.s32.totalorder %s1837_s29, 3 }
  0x18   : > { %2701 = sst [smem:[#allocation12_spill]] %s2213_s28  ;;  %s2745_s0 = smov (%p39_p0, %s38_s0), 0 }
  0x19   : > { %2702 = sst [smem:[#allocation13_spill]] %s2745_s0  ;;  %s2747_s17 = smov (!%p39_p0, %s41_s17), %s2209_s27 }
  0x1a   : > { %p2359_p3 = por %p465_p2, %p464_p1  ;;  %p470_p4 = scmp.ne.s32.totalorder %s2189_s22, %s2185_s21 }
  0x1b   : > { %p43_p5 = scmp.ge.s32.totalorder %s2747_s17, 2  ;;  %p471_p6 = scmp.eq.s32.totalorder %s1838_s30, 3 }
  0x1c   : > { %s2703_s18 = scalar_select %p2359_p3, 1, 0 }
  0x1d   : > { %p1841_p7 = scmp.ge.s32.totalorder %s2213_s28, 1  ;;  %p588_p8 = scmp.lt.s32.totalorder %s2213_s28, 5 }
  0x1e   : > { %2704 = sst [smem:[#allocation14_spill]] %s2703_s18  ;;  %s2749_s17 = smov (%p43_p5, %s2747_s17), 0 }
  0x1f   : > { %2705 = sst [smem:[#allocation15_spill]] %s2749_s17  ;;  %p2369_p9 = por %p471_p6, %p470_p4 }
  0x20   : > { %p589_p10 = pnand %p1841_p7, %p588_p8  ;;  %s451_s20 = ssub.s32 %s2209_s27, %s2749_s17 }
  0x21   : > { %s2706_s19 = scalar_select %p2369_p9, 1, 0 }
  0x22   : > { %s454_s29 = sadd.s32 1, %s2193_s23  ;;  %p452_p11 = scmp.eq.s32.totalorder %s451_s20, 0 }
  0x23   : > { %2707 = sst [smem:[#allocation16_spill]] %s2706_s19  ;;  %592 = sbr.rel (%p589_p10) target bundleno = 2799 (0xaef), region = 84 }
  0x24   : > { %s2377_s0 = scalar_select %p452_p11, %s2193_s23, %s454_s29  }
  0x25   : > { %s2672_s30 = sand.u32 (!%p589_p10), 1, %s2189_s22   ;;  %p684_p12 = scmp.lt.s32.totalorder (!%p589_p10), %s2201_s25, 1 }
  0x26   : > { %2708 = sst [smem:[#allocation17_spill]] %s2377_s0  ;;  %s1842_s26 = sshll.u32 (!%p589_p10), %s2672_s30, 3 }
  0x27   : > { %p691_p13 = scmp.lt.s32.totalorder (!%p589_p10), %s2197_s24, 1  ;;  %s2710_s19 = sld [smem:[#allocation18_spill]] (!%p589_p10) }
  0x28   : > { %s2711_s4 = sld [smem:[#allocation22_spill]] (!%p589_p10)  ;;  %s2712_s6 = sld [smem:[#allocation23_spill]] (!%p589_p10) }
  0x29   : > { %s2714_s10 = sld [smem:[#allocation25_spill]] (!%p589_p10)  ;;  %s2452_s14 = scalar_lea.vmem (!%p589_p10), [#allocation2], %s1842_s26 }
  0x2a   : > { %s2385_s21 = scalar_select %p684_p12, %s2201_s25, 1 }
  0x2b   : > { %s2388_s17 = scalar_select %p691_p13, %s2197_s24, 1 }
  0x2c   : > { %s1843_s20 = sshll.u32 %s2385_s21, 3  ;;  %s2717_s15 = sld [smem:[#allocation8_spill]] }
  0x2d   : > { %s687_s28 = scalar_lea.vmem %s2710_s19, %s1843_s20  ;;  %s1879_s16 = sshll.u32 %s2388_s17, 5 }
  0x2e   : > { %s2402_s25 = scalar_lea.vmem %s2711_s4, %s1879_s16  ;;  %s2411_s27 = scalar_lea.vmem %s2712_s6, %s1879_s16 }
  0x2f   : > { %s2428_s3 = scalar_lea.vmem %s2714_s10, %s1879_s16  ;;  %s720_s24 = scalar_lea.vmem %s2662_s11, %s2388_s17 }
  0x30   : > { %s1882_s6 = sshll.u32 %s2388_s17, 6  ;;  %s728_s23 = scalar_lea.vmem %s2664_s13, %s2388_s17 }
  0x31   : > { %s2442_s20 = scalar_lea.vmem %s2663_s12, %s1882_s6  ;;  %s2715_s4 = sld [smem:[#allocation26_spill]] }
  0x32   : > { %s2716_s10 = sld [smem:[#allocation27_spill]]  ;;  %p1852_p0 = scmp.ne.s32.totalorder %s2717_s15, 0 }
  0x33   : > { %v739_v0 = vld [vmem:[%s687_s28] sm:$0xff] (!%p1852_p0)  ;;  %vm742_vm0 = vcmask (!%p1852_p0), 261120   ;;  %s2719_s30 = sld [smem:[#allocation21_spill]] (!%p1852_p0) }
  0x34   : > { %738 = sbr.rel (%p1852_p0) target bundleno = 366 (0x16e), region = 88  ;;  %v743_v1 = vsel (!%p1852_p0), %vm742_vm0, %v739_v0, 0.0 }
  0x35   : > { %744 = vadd.xlane.f32.xlu0 (!%p1852_p0), %v743_v1 }
  0x37   : > { %s731_s1 = scalar_lea.vmem %s2715_s4, %s2388_s17 }
  0x38   : > { %s734_s9 = scalar_lea.vmem %s2716_s10, %s2388_s17  ;;  %s2718_s10 = sld [smem:[#allocation20_spill]] (!%p1852_p0) }
  0x39   : > { %v1854_v13 = vld [vmem:[%s2719_s30] ss:$0 sm:$0xff] (!%p1852_p0) }
  0x3e   : > { %v1853_v11 = vld [vmem:[%s2718_s10] ss:$0 sm:$0xff] }
  0xc2   : > { %v745_v2 = vpop.xlane.xlu0 %744 }
  0xc3   : > { %v747_v3 = vmul.f32 0.03125, %v745_v2 }
  0xc5   : > { %v748_v4 = vsub.f32 %v739_v0, %v747_v3 }
  0xc7   : > { %v749_v5 = vmul.f32 %v748_v4, %v748_v4 }
  0xc9   : > { %v750_v6 = vsel %vm742_vm0, %v749_v5, 0.0 }
  0xca   : > { %751 = vadd.xlane.f32.xlu0 %v750_v6 }
 0x157   : > { %v752_v7 = vpop.xlane.xlu0 %751 }
 0x158   : > { %v753_v8 = vmul.f32 0.03125, %v752_v7 }
 0x15a   : > { %v754_v9 = vadd.f32 1e-12, %v753_v8 }
 0x15c   : > { %2101 = vrsqrt.f32 %v754_v9 }
 0x166   : > { %v2102_v10 = vpop.eup %2101 }
 0x167   : > { %v756_v12 = vmul.f32 %v2102_v10, %v748_v4 }
 0x169   : > { %v763_v14 = vmul.f32 %v1853_v11, %v756_v12 }
 0x16b   : > { %v770_v15 = vadd.f32 %v1854_v13, %v763_v14 }
 0x16d   : > { %771 = vst.msk [vmem:[%s2452_s14] sm:$0xff] %vm742_vm0, %v770_v15 }
 0x16e PF: > { %v773_v16 = vld [vmem:[%s2402_s25] sm:$0xff]  ;;  %v774_v17 = vld [vmem:[%s2402_s25 + $0x8] sm:$0xff]  ;;  %v775_v18 = vld [vmem:[%s2402_s25 + $0x10] sm:$0xff]  ;;  %v2215_v19 = vmov 0.0|0.0   ;;  %vm2216_vm1 = vmmov 0   ;;  %v2217_v22 = vmov 0.0   ;;  %s2720_s0 = scalar_lea.vmem %s2656_s5, %s2388_s17  ;;  %s2723_s26 = scalar_lea.vmem %s2658_s7, %s2388_s17 }
 0x16f   : > { %1991 = vmatprep.subr.bf16.mxu0 %v2215_v19  ;;  %v1992_v20 = vpack.c.bf16 %v774_v17, %v773_v16  ;;  %v776_v21 = vld [vmem:[%s2402_s25 + $0x18] sm:$0xff]  ;;  %1924 = vmatprep.mubr.msk.f32.mxu0 %vm2216_vm1, %v2217_v22  ;;  %vm784_vm2 = vcmask 261120   ;;  %v1855_v25 = vld [vmem:[%s2720_s0] ss:$0 sm:$0xff]  ;;  %s2218_s19 = smov 112   ;;  %s2219_s22 = smov 96  }
 0x170   : > { %1932 = vmatprep.subr.mxu1 %v2217_v22  ;;  %1934 = vmatprep.mubr.msk.f32.mxu1 %vm2216_vm1, %v2217_v22  ;;  %v1995_v23 = vpack.c.bf16 %v776_v21, %v775_v18  ;;  %s2220_s18 = smov 80   ;;  %vm868_vm3 = vcmask 130048   ;;  %s2721_s15 = sld [smem:[#allocation19_spill]]  ;;  %vm943_vm4 = vcmask 64512   ;;  %v1034_v62 = vld [vmem:[%s2411_s27] sm:$0xff]  ;;  %v1035_v63 = vld [vmem:[%s2411_s27 + $0x8] sm:$0xff] }
 0x171   : > { %1993 = vmatpush3.bf16.msra.mxu0 %v1992_v20  ;;  %s2222_s6 = smov 64   ;;  %v2001_v2 = vpack.c.bf16 %v1035_v63, %v1034_v62  ;;  %v1204_v4 = vld [vmem:[%s2411_s27 + $0x10] sm:$0xff]  ;;  %v1205_v5 = vld [vmem:[%s2411_s27 + $0x18] sm:$0xff]  ;;  %v1866_v14 = vld [vmem:[%s2723_s26] ss:$0 sm:$0xff]  ;;  %s2724_s25 = scalar_lea.vmem %s2659_s8, %s2388_s17  ;;  %vm1519_vm6 = vcmask 523264  }
 0x172   : > { %1994 = vmatprep.subr.bf16.mxu0 %v2215_v19  ;;  %v1998_v6 = vpack.c.bf16 %v1205_v5, %v1204_v4  ;;  %s2725_s0 = sld [smem:[#allocation24_spill]]  ;;  %s2727_s16 = sld [smem:[#allocation9_spill]] }
 0x173   : > { %s1638_s28 = sshll.u32 %s2452_s14, 4  ;;  %s2596_s28 = int_to_ptr.vmem [resolvable:$true] %s1638_s28 }
 0x174   : > { %v2477_v24 = vld [vmem:[%s2452_s14] sm:$0xff] }
 0x175   : > { %1996 = vmatpush3.bf16.msra.mxu0 %v1995_v23 }
 0x176   : > { %1927 = vmatprep.subr.mxu0 %v2217_v22  ;;  %s2722_s4 = scalar_lea.vmem %s2721_s15, %s2385_s21  ;;  %s2221_s21 = smov 48  }
 0x177   : > { %v1857_v32 = vld [vmem:[%s2722_s4] ss:$0 sm:$0xff] }
 0x178   : > { %1925 = vmatmul.mubr.msk.f32.vlgmr.msra.gmra.mrb[0].mxu0 %vm784_vm2, %v2477_v24  ;;  %s1876_s26 = sshll.u32 %s2727_s16, 7 }
 0x179   : > { %1929 = vmatprep.mubr.msk.f32.mxu0 %vm2216_vm1, %v2217_v22 }
 0x24b   : > { %v854_v26 = vpop.f32.mrb[0].mxu0 }
 0x24c   : > { %v855_v27 = vadd.f32 %v1855_v25, %v854_v26  ;;  %v1926_v28 = vpop.f32.mrb[1].mxu0 }
 0x24d   : > { %v1392_v28 = vld [vmem:[%s2428_s3 + $0x8] sm:$0xff] }
 0x24e   : > { %1036 = vrot.lane.b32.xlu1 %v855_v27, %s2218_s19  ;;  %866 = vrot.lane.b32.xlu0 %v855_v27, %s2219_s22  ;;  %s2726_s19 = scalar_lea.vmem %s2725_s0, %s2388_s17  ;;  %s2119_s17 = scalar_lea.vmem %s2596_s28, 128 }
 0x24f   : > { %p2120_p1 = scmp.ne.s32.totalorder %s2596_s28, %s2119_s17 }
 0x251   : > { %p2121_p2 = pnand %p2120_p1, %p2359_p3 }
 0x252   : > { %1038 = vrot.lane.b32.xlu0 %v855_v27, %s2220_s18 }
 0x253   : > { %p2122_p4 = pneg %p2121_p2 }
 0x2c0   : > { %v867_v29 = vpop.permute.xlu0 %866  ;;  %v1037_v31 = vpop.permute.xlu1 %1036 }
 0x2c1   : > { %1928 = vmatpush3.xpose.msk.msra.mxu0 %vm868_vm3, %v867_v29 }
 0x2c2   : > { %1937 = vmatprep.subr.mxu0 %v2217_v22 }
 0x2c4   : > { %1930 = vmatmul.mubr.msk.f32.vlgmr.msra.gmra.mrb[2].mxu0 %vm868_vm3, %v855_v27  ;;  %v1039_v30 = vpop.permute.xlu0 %1038 }
 0x2c5   : > { %1938 = vmatpush3.xpose.msk.msra.mxu0 %vm868_vm3, %v1039_v30  ;;  %1939 = vmatprep.mubr.msk.f32.mxu0 %vm2216_vm1, %v2217_v22  ;;  %v1393_v30 = vld [vmem:[%s2428_s3 + $0x10] sm:$0xff] }
 0x2c6   : > { %1997 = vmatprep.subr.bf16.mxu0 %v2215_v19 }
 0x2c8   : > { %1940 = vmatmul.mubr.msk.f32.vlgmr.msra.gmra.mrb[4].mxu0 %vm868_vm3, %v1037_v31  ;;  %v1394_v31 = vld [vmem:[%s2428_s3 + $0x18] sm:$0xff] }
 0x2c9   : > { %1951 = vmatprep.mubr.msk.f32.mxu0 %vm2216_vm1, %v2217_v22  ;;  %1999 = vmatpush3.bf16.msra.mxu0 %v1998_v6 }
 0x2ca   : > { %2003 = vmatprep.subr.bf16.mxu0 %v2215_v19 }
 0x397   : > { %v939_v33 = vpop.f32.mrb[2].mxu0 }
 0x398   : > { %v940_v34 = vadd.f32 %v1857_v32, %v939_v33  ;;  %v1931_v35 = vpop.f32.mrb[3].mxu0 }
 0x39a   : > { %v944_v36 = vsel %vm943_vm4, %v940_v34, -inf }
 0x39b   : > { %945 = vmax.xlane.f32.xlu1 %v944_v36  ;;  %v1110_v37 = vpop.f32.mrb[4].mxu0  ;;  %v1867_v36 = vld [vmem:[%s2724_s25] ss:$0 sm:$0xff] }
 0x39c   : > { %v1111_v38 = vadd.f32 %v1857_v32, %v1110_v37  ;;  %v1941_v39 = vpop.f32.mrb[5].mxu0 }
 0x39e   : > { %v1114_v40 = vsel %vm943_vm4, %v1111_v38, -inf }
 0x39f   : > { %1115 = vmax.xlane.f32.xlu0 %v1114_v40 }
 0x428   : > { %v946_v41 = vpop.xlane.xlu1 %945 }
 0x429   : > { %v947_v42 = vsub.f32 %v940_v34, %v946_v41  ;;  %v1504_v41 = vld [vmem:[%s2442_s20] sm:$0xff] }
 0x42b   : > { %v948_v43 = vmul.f32 1.442695, %v947_v42  ;;  %v1505_v42 = vld [vmem:[%s2442_s20 + $0x8] sm:$0xff] }
 0x42c   : > { %v1116_v44 = vpop.xlane.xlu0 %1115 }
 0x42d   : > { %2103 = vpow2.f32 %v948_v43  ;;  %v1117_v45 = vsub.f32 %v1111_v38, %v1116_v44  ;;  %v1868_v38 = vld [vmem:[%s2726_s19] ss:$0 sm:$0xff]  ;;  %v2010_v43 = vpack.c.bf16 %v1505_v42, %v1504_v41  ;;  %v1506_v44 = vld [vmem:[%s2442_s20 + $0x10] sm:$0xff] }
 0x42f   : > { %v1118_v46 = vmul.f32 1.442695, %v1117_v45  ;;  %v1507_v45 = vld [vmem:[%s2442_s20 + $0x18] sm:$0xff] }
 0x431   : > { %2105 = vpow2.f32 %v1118_v46  ;;  %v2013_v46 = vpack.c.bf16 %v1507_v45, %v1506_v44 }
 0x437   : > { %v2104_v47 = vpop.eup %2103 }
 0x438   : > { %v950_v48 = vsel %vm943_vm4, %v2104_v47, 0.0 }
 0x439   : > { %951 = vadd.xlane.f32.xlu0 %v950_v48  ;;  %v1509_v48 = vld [vmem:[%s2442_s20 + $0x28] sm:$0xff] }
 0x43b   : > { %v2106_v49 = vpop.eup %2105 }
 0x43c   : > { %v1120_v50 = vsel %vm943_vm4, %v2106_v49, 0.0 }
 0x43d   : > { %1121 = vadd.xlane.f32.xlu1 %v1120_v50  ;;  %v1510_v50 = vld [vmem:[%s2442_s20 + $0x30] sm:$0xff] }
 0x44e   : > { %1128 = vrot.lane.b32.xlu1 %v855_v27, %s2221_s21 }
 0x44f   : > { %958 = vrot.lane.b32.xlu0 %v855_v27, %s2222_s6  ;;  %v1391_v27 = vld [vmem:[%s2428_s3] sm:$0xff]  ;;  %s2732_s3 = sld [smem:[#allocation28_spill]] }
 0x450   : > { %v2004_v29 = vpack.c.bf16 %v1392_v28, %v1391_v27 }
 0x455   : > { %s2594_s29 = scalar_lea.hbm %s2732_s3, %s1876_s26 }
 0x4c6   : > { %v952_v51 = vpop.xlane.xlu0 %951 }
 0x4c7   : > { %2107 = vrcp.f32 %v952_v51 }
 0x4ca   : > { %v1122_v52 = vpop.xlane.xlu1 %1121  ;;  %v959_v53 = vpop.permute.xlu0 %958 }
 0x4cb   : > { %2109 = vrcp.f32 %v1122_v52  ;;  %1933 = vmatpush3.msra.mxu1 %v959_v53  ;;  %v1869_v53 = vld [vmem:[%s720_s24] ss:$0 sm:$0xff] }
 0x4cc   : > { %1942 = vmatprep.subr.mxu1 %v2217_v22 }
 0x4ce   : > { %v1129_v1 = vpop.permute.xlu1 %1128 }
 0x4d1   : > { %v2108_v54 = vpop.eup %2107 }
 0x4d2   : > { %v954_v55 = vmul.f32 %v2108_v54, %v952_v51  ;;  %v1511_v51 = vld [vmem:[%s2442_s20 + $0x38] sm:$0xff] }
 0x4d4   : > { %v955_v56 = vsub.f32 2.0, %v954_v55 }
 0x4d5   : > { %v2110_v57 = vpop.eup %2109 }
 0x4d6   : > { %v956_v58 = vmul.f32 %v2108_v54, %v955_v56  ;;  %v1124_v59 = vmul.f32 %v2110_v57, %v1122_v52  ;;  %v2019_v52 = vpack.c.bf16 %v1511_v51, %v1510_v50 }
 0x4d8   : > { %v957_v60 = vmul.f32 %v2104_v47, %v956_v58  ;;  %v1125_v61 = vsub.f32 2.0, %v1124_v59  ;;  %v1508_v47 = vld [vmem:[%s2442_s20 + $0x20] sm:$0xff] }
 0x4da   : > { %v1126_v0 = vmul.f32 %v2110_v57, %v1125_v61  ;;  %1935 = vmatmul.mubr.msk.f32.vlgmr.msra.gmra.mrb[0].mxu1 %vm943_vm4, %v957_v60 }
 0x4db   : > { %1943 = vmatpush3.msra.mxu1 %v1129_v1  ;;  %1944 = vmatprep.mubr.msk.f32.mxu1 %vm2216_vm1, %v2217_v22 }
 0x4dc   : > { %v1127_v3 = vmul.f32 %v2106_v49, %v1126_v0  ;;  %2000 = vmatprep.subr.bf16.mxu1 %v2215_v19  ;;  %v2016_v49 = vpack.c.bf16 %v1509_v48, %v1508_v47 }
 0x4de   : > { %1945 = vmatmul.mubr.msk.f32.vlgmr.msra.gmra.mrb[2].mxu1 %vm943_vm4, %v1127_v3 }
 0x4df   : > { %2002 = vmatpush3.bf16.msra.mxu1 %v2001_v2  ;;  %1958 = vmatprep.mubr.msk.f32.mxu1 %vm2216_vm1, %v2217_v22 }
 0x4e0   : > { %2009 = vmatprep.subr.bf16.mxu1 %v2215_v19 }
 0x5ad   : > { %v1030_v7 = vpop.f32.mrb[0].mxu1 }
 0x5ae   : > { %v1936_v8 = vpop.f32.mrb[1].mxu1  ;;  %1959 = vmatmul.mubr.msk.f32.vlgmr.msra.gmra.mrb[4].mxu1 %vm868_vm3, %v1030_v7 }
 0x5af   : > { %1988 = vmatprep.mubr.msk.f32.mxu1 %vm2216_vm1, %v2217_v22  ;;  %2011 = vmatpush3.bf16.msra.mxu1 %v2010_v43 }
 0x5b0   : > { %2012 = vmatprep.subr.bf16.mxu1 %v2215_v19 }
 0x5b1   : > { %v1200_v9 = vpop.f32.mrb[2].mxu1 }
 0x5b2   : > { %v1946_v10 = vpop.f32.mrb[3].mxu1  ;;  %1952 = vmatmul.mubr.msk.f32.vlgmr.msra.gmra.mrb[6].mxu0 %vm868_vm3, %v1200_v9 }
 0x5b3   : > { %1969 = vmatprep.mubr.msk.f32.mxu0 %vm2216_vm1, %v2217_v22  ;;  %2005 = vmatpush3.bf16.msra.mxu0 %v2004_v29 }
 0x5b4   : > { %2006 = vmatprep.subr.bf16.mxu0 %v2215_v19  ;;  %2014 = vmatpush3.bf16.msra.mxu1 %v2013_v46 }
 0x5b5   : > { %2015 = vmatprep.subr.bf16.mxu1 %v2215_v19 }
 0x5b8   : > { %2017 = vmatpush3.bf16.msra.mxu1 %v2016_v49 }
 0x5b9   : > { %2018 = vmatprep.subr.bf16.mxu1 %v2215_v19 }
 0x5bc   : > { %2020 = vmatpush3.bf16.msra.mxu1 %v2019_v52 }
 0x681   : > { %v1348_v11 = vpop.f32.mrb[4].mxu1 }
 0x682   : > { %v1960_v12 = vpop.f32.mrb[5].mxu1 }
 0x685   : > { %v1275_v13 = vpop.f32.mrb[6].mxu0 }
 0x686   : > { %v1349_v15 = vadd.f32 %v1348_v11, %v1275_v13  ;;  %v1953_v16 = vpop.f32.mrb[7].mxu0 }
 0x688   : > { %v1359_v17 = vadd.f32 %v1866_v14, %v1349_v15  ;;  %v2223_v15 = vmov -1.0  }
 0x68a   : > { %v1360_v18 = vadd.f32 %v1359_v17, %v2477_v24  ;;  %v2007_v24 = vpack.c.bf16 %v1394_v31, %v1393_v30 }
 0x68c   : > { %v1363_v20 = vsel %vm784_vm2, %v1360_v18, 0.0  ;;  %2008 = vmatpush3.bf16.msra.mxu0 %v2007_v24 }
 0x68d   : > { %1364 = vadd.xlane.f32.xlu1 %v1363_v20 }
 0x71a   : > { %v1365_v21 = vpop.xlane.xlu1 %1364 }
 0x71b   : > { %v1367_v22 = vmul.f32 0.03125, %v1365_v21 }
 0x71d   : > { %v1368_v23 = vsub.f32 %v1360_v18, %v1367_v22  ;;  %v1871_v22 = vld [vmem:[%s728_s23] ss:$0 sm:$0xff]  ;;  %s2728_s23 = sld [smem:[#allocation6_spill]] }
 0x71f   : > { %v1369_v25 = vmul.f32 %v1368_v23, %v1368_v23 }
 0x721   : > { %v1370_v26 = vsel %vm784_vm2, %v1369_v25, 0.0 }
 0x722   : > { %1371 = vadd.xlane.f32.xlu0 %v1370_v26 }
 0x7af   : > { %v1372_v32 = vpop.xlane.xlu0 %1371 }
 0x7b0   : > { %v1373_v33 = vmul.f32 0.03125, %v1372_v32 }
 0x7b2   : > { %v1374_v34 = vadd.f32 1e-12, %v1373_v33 }
 0x7b4   : > { %2111 = vrsqrt.f32 %v1374_v34 }
 0x7be   : > { %v2112_v35 = vpop.eup %2111 }
 0x7bf   : > { %v1376_v37 = vmul.f32 %v2112_v35, %v1368_v23 }
 0x7c1   : > { %v1383_v39 = vmul.f32 %v1867_v36, %v1376_v37  ;;  %v1873_v37 = vld [vmem:[%s731_s1] ss:$0 sm:$0xff]  ;;  %s2733_s1 = sand.u32 1, %s2728_s23  }
 0x7c2   : > { %s1625_s0 = scalar_lea.sflag [#allocation3], %s2733_s1 }
 0x7c3   : > { %v2551_v40 = vadd.f32 %v1868_v38, %v1383_v39  ;;  %v1874_v39 = vld [vmem:[%s734_s9] ss:$0 sm:$0xff]  ;;  %s2224_s9 = smov [#allocation2]  }
 0x7c4   : > { %s2123_s19 = sshll.u32 %s2224_s9, 4  ;;  %s2124_s19 = int_to_ptr.vmem [resolvable:$false] %s2123_s19 }
 0x7c5   : > { %1970 = vmatmul.mubr.msk.f32.vlgmr.msra.gmra.mrb[8].mxu0 %vm784_vm2, %v2551_v40  ;;  %s2125_s22 = scalar_lea.vmem %s2124_s19, 256  ;;  %p2126_p5 = scmp.lt.s32.totalorder %s2596_s28, %s2124_s19 }
 0x7c6   : > { %p2127_p6 = scmp.lt.s32.totalorder %s2125_s22, %s2119_s17 }
 0x7c8   : > { %p2128_p7 = por %p2127_p6, %p2126_p5 }
 0x7ca   : > { %p2129_p8 = pnand %p2128_p7, %p2122_p4 }
 0x898   : > { %v1471_v54 = vpop.f32.mrb[8].mxu0 }
 0x899   : > { %v1472_v55 = vadd.f32 %v1869_v53, %v1471_v54  ;;  %v1971_v56 = vpop.f32.mrb[9].mxu0 }
 0x89b   : > { %v1476_v57 = vmul.f32 0.70710677, %v1472_v55  ;;  %v1475_v18 = vmul.f32 0.5, %v1472_v55 }
 0x89d   : > { %v1479_v58 = vand.u32 2147483647, %v1476_v57  ;;  %vm1477_vm5 = vcmp.ge.f32.partialorder %v1476_v57, 0.0 }
 0x89e   : > { %v1478_v16 = vsel %vm1477_vm5, 1.0, %v2223_v15 }
 0x89f   : > { %v1480_v59 = vmul.f32 0.3275911, %v1479_v58  ;;  %v1495_v19 = vsub.f32 0.0, %v1479_v58 }
 0x8a1   : > { %v1481_v60 = vadd.f32 1.0, %v1480_v59  ;;  %v1496_v1 = vmul.f32 %v1495_v19, %v1479_v58 }
 0x8a3   : > { %2113 = vrcp.f32 %v1481_v60  ;;  %v1497_v4 = vmul.f32 1.442695, %v1496_v1 }
 0x8a5   : > { %2115 = vpow2.f32 %v1497_v4 }
 0x8ad   : > { %v2114_v61 = vpop.eup %2113 }
 0x8ae   : > { %v1483_v62 = vmul.f32 %v2114_v61, %v1481_v60 }
 0x8af   : > { %v2116_v12 = vpop.eup %2115 }
 0x8b0   : > { %v1484_v63 = vsub.f32 2.0, %v1483_v62 }
 0x8b2   : > { %v1485_v0 = vmul.f32 %v2114_v61, %v1484_v63 }
 0x8b4   : > { %v1486_v2 = vmul.f32 1.0614054, %v1485_v0 }
 0x8b6   : > { %v1487_v3 = vadd.f32 -1.4531521, %v1486_v2 }
 0x8b8   : > { %v1488_v5 = vmul.f32 %v1487_v3, %v1485_v0 }
 0x8ba   : > { %v1489_v6 = vadd.f32 1.4214138, %v1488_v5 }
 0x8bc   : > { %v1490_v7 = vmul.f32 %v1489_v6, %v1485_v0 }
 0x8be   : > { %v1491_v8 = vadd.f32 -0.28449672, %v1490_v7 }
 0x8c0   : > { %v1492_v9 = vmul.f32 %v1491_v8, %v1485_v0 }
 0x8c2   : > { %v1493_v10 = vadd.f32 0.2548296, %v1492_v9 }
 0x8c4   : > { %v1494_v11 = vmul.f32 %v1493_v10, %v1485_v0 }
 0x8c6   : > { %v1499_v13 = vmul.f32 %v2116_v12, %v1494_v11 }
 0x8c8   : > { %v1500_v14 = vsub.f32 1.0, %v1499_v13 }
 0x8ca   : > { %v1501_v17 = vmul.f32 %v1500_v14, %v1478_v16 }
 0x8cc   : > { %v1502_v20 = vadd.f32 1.0, %v1501_v17 }
 0x8ce   : > { %v1503_v21 = vmul.f32 %v1502_v20, %v1475_v18 }
 0x8d0   : > { %1989 = vmatmul.mubr.msk.f32.vlgmr.msra.gmra.mrb[6].mxu1 %vm1519_vm6, %v1503_v21 }
 0x9a3   : > { %v1589_v23 = vpop.f32.mrb[6].mxu1 }
 0x9a4   : > { %v1590_v25 = vadd.f32 %v1871_v22, %v1589_v23  ;;  %v1990_v26 = vpop.f32.mrb[7].mxu1 }
 0x9a6   : > { %v1593_v27 = vadd.f32 %v1590_v25, %v2551_v40 }
 0x9a8   : > { %v1596_v28 = vsel %vm784_vm2, %v1593_v27, 0.0 }
 0x9a9   : > { %1597 = vadd.xlane.f32.xlu0 %v1596_v28 }
 0xa36   : > { %v1598_v29 = vpop.xlane.xlu0 %1597 }
 0xa37   : > { %v1599_v30 = vmul.f32 0.03125, %v1598_v29 }
 0xa39   : > { %v1600_v31 = vsub.f32 %v1593_v27, %v1599_v30 }
 0xa3b   : > { %v1601_v24 = vmul.f32 %v1600_v31, %v1600_v31 }
 0xa3d   : > { %v1602_v32 = vsel %vm784_vm2, %v1601_v24, 0.0 }
 0xa3e   : > { %1603 = vadd.xlane.f32.xlu1 %v1602_v32 }
 0xacb   : > { %v1604_v33 = vpop.xlane.xlu1 %1603 }
 0xacc   : > { %v1605_v34 = vmul.f32 0.03125, %v1604_v33 }
 0xace   : > { %v1606_v35 = vadd.f32 1e-12, %v1605_v34 }
 0xad0   : > { %2117 = vrsqrt.f32 %v1606_v35 }
 0xada   : > { %v2118_v36 = vpop.eup %2117 }
 0xadb   : > { %v1608_v38 = vmul.f32 %v2118_v36, %v1600_v31 }
 0xadd   : > { %v1615_v40 = vmul.f32 %v1873_v37, %v1608_v38 }
 0xadf   : > { %v1622_v41 = vadd.f32 %v1874_v39, %v1615_v40 }
 0xae1   : > { %1623 = vst.msk [vmem:[%s2452_s14] sm:$0xff] %vm784_vm2, %v1622_v41 }
 0xae2   : > { %2132 = shalt.err (!%p2129_p8)
}
 0xae3   : > { %s2133_s14 = scalar_lea.hbm %s2594_s29, 128  ;;  %s2137_s20 = scalar_lea.hbm %s2732_s3, 256 }
 0xae4   : > { %p2134_p10 = scmp.ne.s32.totalorder %s2594_s29, %s2133_s14  ;;  %p2138_p13 = scmp.lt.u32.totalorder %s2594_s29, %s2732_s3 }
 0xae5   : > { %p2139_p0 = scmp.lt.u32.totalorder %s2137_s20, %s2133_s14  ;;  %p2141_p2 = scmp.lt.u32.totalorder %s2133_s14, %s2594_s29 }
 0xae6   : > { %p2135_p11 = pnand %p2134_p10, %p2359_p3 }
 0xae7   : > { %p2140_p1 = por %p2139_p0, %p2138_p13 }
 0xae8   : > { %p2136_p12 = pneg %p2135_p11 }
 0xae9   : > { %p2142_p4 = por %p2141_p2, %p2140_p1 }
 0xaeb   : > { %p2143_p5 = pnand %p2142_p4, %p2136_p12 }
 0xaed   : > { %2146 = shalt.err (!%p2143_p5)
}
 0xaee   : > { %2021 = dma.vmem_to_hbm [thread:$0]  (%p2359_p3), %s2596_s28, 128, %s2594_s29, %s1625_s0  }
 0xaef PF: > { %s2734_s15 = sld [smem:[#allocation12_spill]]  ;;  %s2735_s4 = sld [smem:[#allocation5_spill]] }
 0xaf5   : > { %p2027_p6 = scmp.ge.s32.totalorder %s2734_s15, 2  ;;  %s1650_s6 = sand.u32 1, %s2735_s4  }
 0xaf6   : > { %s1651_s27 = scalar_lea.sflag [#allocation3], %s1650_s6 }
 0xaf7   : > { %p2024_p7 = pnand %p2027_p6, %p2369_p9 }
 0xaf9   : > { %2180 = dma.done.wait (!%p2024_p7), %s1651_s27, 128  }
 0xafa   : > { %2182 = vsyncadd (!%p2024_p7), %s1651_s27, 4294967168  ;;  %s29_s28 = sadd.s32 1, %s2734_s15   ;;  %s2737_s21 = sld [smem:[#allocation6_spill]] }
 0xafb   : > { %p26_p8 = scmp.ge.s32.totalorder %s29_s28, 6   ;;  %s2738_s22 = sld [smem:[#allocation7_spill]] }
 0xafc   : > { %s2739_s23 = sld [smem:[#allocation17_spill]]  ;;  %s2740_s24 = sld [smem:[#allocation10_spill]] }
 0xafd   : > { %s2741_s25 = sld [smem:[#allocation11_spill]]  ;;  %s2742_s26 = sld [smem:[#allocation13_spill]] }
 0xafe   : > { %s2743_s27 = sld [smem:[#allocation15_spill]]  ;;  %28 = sbr.rel (!%p26_p8) target bundleno = 17 (0x11), region = 162 }
 0xb05   :  { %1656 = vsyncpa [#allocation3], 1 }
 0xb06   :  { %1658 = vsyncpa [#allocation3 + $0x1], 1 }

</bundles_post_ra>
